<compile_context>
chip_gen: v6e
topology: v6e:2x2x1
jax: 0.10.0
libtpu: 0.0.40
codegen_flags: <defaults>
</compile_context>

<pallas_src>
import jax
import jax.numpy as jnp
from jax.experimental import pallas as pl
from jax.experimental.pallas import tpu as pltpu


def _round_up(x, m):
    return (x + m - 1) // m * m


# ----------------------------------------------------------------------------
# Capability probe: single-buffering for VMEM-resident operands.
# ----------------------------------------------------------------------------
_UNSET = object()
_RESIDENT_MODE = _UNSET


def _resident_pipeline_mode():
    """Return pl.Buffered(1) if this jax/Mosaic supports single-buffering a
    constant-index (VMEM-resident) operand, else None (default buffering).
    Probed once with a tiny copy kernel so an unsupported version degrades
    gracefully instead of failing to compile."""
    global _RESIDENT_MODE
    if _RESIDENT_MODE is _UNSET:
        try:
            mode = pl.Buffered(1)

            def _probe(x_ref, o_ref):
                o_ref[...] = x_ref[...]

            out = pl.pallas_call(
                _probe,
                out_shape=jax.ShapeDtypeStruct((8, 128), jnp.float32),
                grid=(1,),
                in_specs=[pl.BlockSpec((8, 128), lambda i: (0, 0),
                                       pipeline_mode=mode)],
                out_specs=pl.BlockSpec((8, 128), lambda i: (0, 0)),
            )(jnp.zeros((8, 128), jnp.float32))
            jax.block_until_ready(out)
            _RESIDENT_MODE = mode
        except Exception:
            _RESIDENT_MODE = None
    return _RESIDENT_MODE


# ----------------------------------------------------------------------------
# Kernels
# ----------------------------------------------------------------------------
def _row_argmax(scores):
    """First-occurrence argmax over the last axis (matches torch.argmax).
    log_softmax is monotone, so argmax(scores) == argmax(log_softmax(scores));
    the exp/log/sum is dead weight for y_hat and is dropped.
    NOTE(perf review): jnp.argmax would fuse this into one variadic reduce,
    but lax.argmax_p lowering is not universally available in Mosaic, so we
    keep the guaranteed-lowerable max + iota + min form."""
    t_pad = scores.shape[-1]
    idx = jax.lax.broadcasted_iota(jnp.int32, scores.shape, 1)
    maxv = jnp.max(scores, axis=-1, keepdims=True)
    return jnp.min(jnp.where(scores == maxv, idx, t_pad), axis=-1).astype(jnp.int32)


def _classifier_kernel(h_ref, w1_ref, b1_ref, w2_ref, b2_ref, yhat_ref):
    # lin1 + relu: bf16 MXU matmul, f32 accumulation / f32 elementwise epilogue.
    hidden = jnp.dot(h_ref[...], w1_ref[...], preferred_element_type=jnp.float32)
    hidden = jnp.maximum(hidden + b1_ref[...], 0.0)            # (TILE_N, H_pad) f32
    # lin2
    scores = jnp.dot(hidden.astype(jnp.bfloat16), w2_ref[...],
                     preferred_element_type=jnp.float32) + b2_ref[...]
    yhat_ref[...] = _row_argmax(scores)[None, None, :]          # lane-dense store


def _classifier_kernel_ktiled(h_ref, w1_ref, b1_ref, w2_ref, b2_ref,
                              yhat_ref, acc_ref):
    """Reduction-tiled variant: grid = (N tiles, K tiles over d_in)."""
    k = pl.program_id(1)

    @pl.when(k == 0)
    def _():
        acc_ref[...] = jnp.zeros_like(acc_ref)

    acc_ref[...] += jnp.dot(h_ref[...], w1_ref[...],
                            preferred_element_type=jnp.float32)

    @pl.when(k == pl.num_programs(1) - 1)
    def _():
        hidden = jnp.maximum(acc_ref[...] + b1_ref[...], 0.0)
        scores = jnp.dot(hidden.astype(jnp.bfloat16), w2_ref[...],
                         preferred_element_type=jnp.float32) + b2_ref[...]
        yhat_ref[...] = _row_argmax(scores)[None, None, :]


# ----------------------------------------------------------------------------
# Wrapper
# ----------------------------------------------------------------------------
def prepare_params(w1, b1, w2, b2, *, k_tile=None):
    """One-time parameter prep, hoisted out of the per-call forward path:
      * (in, out) pre-transposed weights, zero-padded to lane multiples,
      * bf16 weights for the MXU, f32 biases,
      * padded tag columns get -FLT_MAX bias so they never win the argmax,
      * optional d_in padding to a multiple of `k_tile` (reduction tiling for
        v7x-sized weights: use k_tile≈512 when 2*d_in*H_pad bytes nears 32MiB).
    """
    d_in, hidden = w1.shape
    h2, tags = w2.shape
    assert h2 == hidden
    if k_tile is not None:
        assert k_tile % 128 == 0, "k_tile must be a multiple of 128"
    h_pad = _round_up(hidden, 128)
    t_pad = _round_up(tags, 128)
    d_pad = d_in if k_tile is None else _round_up(d_in, k_tile)
    neg = float(jnp.finfo(jnp.float32).min)
    w1_p = jnp.pad(w1, ((0, d_pad - d_in), (0, h_pad - hidden))).astype(jnp.bfloat16)
    b1_p = jnp.pad(jnp.reshape(b1, (1, -1)),
                   ((0, 0), (0, h_pad - hidden))).astype(jnp.float32)
    w2_p = jnp.pad(w2, ((0, h_pad - hidden), (0, t_pad - tags))).astype(jnp.bfloat16)
    b2_p = jnp.pad(jnp.reshape(b2, (1, -1)), ((0, 0), (0, t_pad - tags)),
                   constant_values=neg).astype(jnp.float32)
    return {"w1": w1_p, "b1": b1_p, "w2": w2_p, "b2": b2_p,
            "d_in": d_in, "tag_size": tags, "k_tile": k_tile}


def _default_tile_n(n, d_stream, h_pad, t_pad):
    # Grid steps carry ~0.35us fixed overhead, so use the biggest N tile whose
    # double-buffered bf16 h stream + f32 intermediates fit a modest budget
    # (the rest of VMEM holds the resident weights); cap at 1024 for v7x.
    per_row = 2 * d_stream * 2 + (h_pad + t_pad) * 4 + h_pad * 4
    cap = max(128, ((24 << 20) // max(per_row, 1)) // 128 * 128)
    return min(1024, cap, _round_up(max(n, 1), 128))


def _vmem_limit_bytes(estimate):
    want = int(estimate * 1.5) + (4 << 20)          # slack for compiler scratch
    try:
        cap = int(pltpu.get_tpu_info().vmem_capacity_bytes) - (8 << 20)
    except Exception:
        cap = 56 << 20                              # conservative: v7x = 64 MiB/TC
    return max(min(want, cap), 32 << 20)


def classifier_forward(h, params, *, tile_n=None):
    """h: (N, D_in), ideally bf16 (cast fused into the producer).  Returns
    y_hat: (N,) int32.  Out-of-range rows of the last N tile read unspecified
    VMEM and compute garbage argmax values; that is safe ONLY because they are
    sliced off below — keep that invariant."""
    w1, b1, w2, b2 = params["w1"], params["b1"], params["w2"], params["b2"]
    k_tile = params["k_tile"]
    n, d_in = h.shape
    assert d_in == params["d_in"], (d_in, params["d_in"])
    if n == 0:                                     # zero-size grid guard
        return jnp.zeros((0,), jnp.int32)

    d_pad, h_pad = w1.shape
    t_pad = w2.shape[1]

    if h.dtype != jnp.bfloat16:
        # Fallback cast: prefer handing bf16 in directly so the only streamed
        # operand is already half-width and this extra pass disappears.
        h = h.astype(jnp.bfloat16)
    if d_pad != d_in:
        # K-tiled path only: zero-pad the reduction dim so partial K blocks of
        # h @ w1 contribute exactly zero (w1's padded rows are zero as well).
        h = jnp.pad(h, ((0, 0), (0, d_pad - d_in)))

    d_stream = k_tile if k_tile is not None else d_pad
    if tile_n is None:
        tile_n = _default_tile_n(n, d_stream, h_pad, t_pad)
    num_tiles = int(pl.cdiv(n, tile_n))

    resident = _resident_pipeline_mode()
    wmul = 1 if resident is not None else 2

    def rspec(shape, index_map):
        # Constant block index => fetched once, VMEM-resident; single-buffer
        # when supported so the weights are not held twice.
        if resident is None:
            return pl.BlockSpec(shape, index_map)
        return pl.BlockSpec(shape, index_map, pipeline_mode=resident)

    cost = pl.CostEstimate(
        flops=2 * n * (d_pad * h_pad + h_pad * t_pad),
        transcendentals=0,
        bytes_accessed=int(n * d_pad * 2 + (int(w1.size) + int(w2.size)) * 2
                           + (h_pad + t_pad) * 4 + num_tiles * tile_n * 4),
    )
    out_shape = jax.ShapeDtypeStruct((num_tiles, 1, tile_n), jnp.int32)

    if k_tile is None:
        vmem_est = (2 * tile_n * d_pad * 2                       # h tile (bf16, 2 bufs)
                    + wmul * (d_pad * h_pad + h_pad * t_pad) * 2  # resident weights
                    + wmul * (h_pad + t_pad) * 4                  # biases
                    + tile_n * (h_pad + t_pad) * 4                # f32 intermediates
                    + 2 * tile_n * 4)                             # output tile
        out = pl.pallas_call(
            _classifier_kernel,
            out_shape=out_shape,
            grid=(num_tiles,),
            in_specs=[
                pl.BlockSpec((tile_n, d_pad), lambda i: (i, 0)),
                rspec((d_pad, h_pad), lambda i: (0, 0)),
                rspec((1, h_pad), lambda i: (0, 0)),
                rspec((h_pad, t_pad), lambda i: (0, 0)),
                rspec((1, t_pad), lambda i: (0, 0)),
            ],
            out_specs=pl.BlockSpec((1, 1, tile_n), lambda i: (i, 0, 0)),
            compiler_params=pltpu.CompilerParams(
                dimension_semantics=("parallel",),
                vmem_limit_bytes=_vmem_limit_bytes(vmem_est)),
            cost_estimate=cost,
        )(h, w1, b1, w2, b2)
    else:
        num_k = d_pad // k_tile
        vmem_est = (2 * tile_n * k_tile * 2          # h tile
                    + 2 * k_tile * h_pad * 2         # streamed w1 slab (2 bufs)
                    + wmul * h_pad * t_pad * 2       # resident w2
                    + wmul * (h_pad + t_pad) * 4     # biases
                    + tile_n * h_pad * 4             # f32 accumulator scratch
                    + tile_n * t_pad * 4             # scores intermediate
                    + 2 * tile_n * 4)                # output tile
        out = pl.pallas_call(
            _classifier_kernel_ktiled,
            out_shape=out_shape,
            grid=(num_tiles, num_k),
            in_specs=[
                pl.BlockSpec((tile_n, k_tile), lambda i, k: (i, k)),
                pl.BlockSpec((k_tile, h_pad), lambda i, k: (k, 0)),
                rspec((1, h_pad), lambda i, k: (0, 0)),
                rspec((h_pad, t_pad), lambda i, k: (0, 0)),
                rspec((1, t_pad), lambda i, k: (0, 0)),
            ],
            out_specs=pl.BlockSpec((1, 1, tile_n), lambda i, k: (i, 0, 0)),
            scratch_shapes=[pltpu.VMEM((tile_n, h_pad), jnp.float32)],
            compiler_params=pltpu.CompilerParams(
                dimension_semantics=("parallel", "arbitrary"),
                vmem_limit_bytes=_vmem_limit_bytes(vmem_est)),
            cost_estimate=cost,
        )(h, w1, b1, w2, b2)

    return out.reshape(-1)[:n]


def init_params(key, input_dim, hidden_size, tag_size):
    """Deterministic PyTorch-style (Kaiming-uniform-ish) init, pre-transposed."""
    k1, k2, k3, k4 = jax.random.split(key, 4)
    bound1 = 1.0 / (input_dim ** 0.5)
    bound2 = 1.0 / (hidden_size ** 0.5)
    w1 = jax.random.uniform(k1, (input_dim, hidden_size), jnp.float32, -bound1, bound1)
    b1 = jax.random.uniform(k2, (1, hidden_size), jnp.float32, -bound1, bound1)
    w2 = jax.random.uniform(k3, (hidden_size, tag_size), jnp.float32, -bound2, bound2)
    b2 = jax.random.uniform(k4, (1, tag_size), jnp.float32, -bound2, bound2)
    return w1, b1, w2, b2


if __name__ == "__main__":
    N, INPUT_DIM, HIDDEN, TAGS = 10, 320, 48, 7

    key = jax.random.PRNGKey(0)
    k_h, k_p = jax.random.split(key)
    h = jax.random.normal(k_h, (N, INPUT_DIM), jnp.float32)
    w1, b1, w2, b2 = init_params(k_p, INPUT_DIM, HIDDEN, TAGS)

    # The producer (encoder) hands the classifier bf16 activations.
    h_bf16 = h.astype(jnp.bfloat16)

    # One-time parameter prep (hoisted out of the per-call path).
    params = prepare_params(w1, b1, w2, b2)
    y_hat = classifier_forward(h_bf16, params)
    jax.block_until_ready(y_hat)

    # Reduction-tiled variant (v7x-style), exercised at toy size: k_tile=128
    # gives 3 K steps over the zero-padded 384-wide reduction dim.
    params_kt = prepare_params(w1, b1, w2, b2, k_tile=128)
    y_hat_kt = classifier_forward(h_bf16, params_kt)
    jax.block_until_ready(y_hat_kt)

    # Reference mirroring the kernel's bf16-matmul / f32-accum numerics.
    hidden_ref = jnp.maximum(
        jnp.dot(h_bf16, w1.astype(jnp.bfloat16),
                preferred_element_type=jnp.float32) + b1, 0.0)
    scores_ref = jnp.dot(hidden_ref.astype(jnp.bfloat16), w2.astype(jnp.bfloat16),
                         preferred_element_type=jnp.float32) + b2
    y_ref = jnp.argmax(jax.nn.log_softmax(scores_ref, axis=-1), axis=-1).astype(jnp.int32)

    def check(y):
        assert y.shape == (N,) and y.dtype == jnp.int32
        assert bool(jnp.all((y >= 0) & (y < TAGS)))
        exact = y == y_ref
        # Accumulation-order differences (bf16 inputs, f32 accum) may flip
        # genuine near-ties; any disagreement must still be a near-tie.
        picked = jnp.take_along_axis(scores_ref, y[:, None].astype(jnp.int32),
                                     axis=-1)[:, 0]
        best = jnp.max(scores_ref, axis=-1)
        near_tie = jnp.abs(best - picked) <= 1e-2 * (1.0 + jnp.abs(best))
        assert bool(jnp.all(exact | near_tie)), (y, y_ref)

    check(y_hat)
    check(y_hat_kt)

    print("KERNEL_OK")
</pallas_src>

<mosaic_0001>
module attributes {stable_mosaic.version = 11 : i64} {
  func.func @_probe(%arg0: i32, %arg1: memref<8x128xf32, #tpu.memory_space<vmem>>, %arg2: memref<8x128xf32, #tpu.memory_space<vmem>>) attributes {dimension_semantics = [#tpu.dimension_semantics<arbitrary>], iteration_bounds = array<i64: 1>, scalar_prefetch = 0 : i64, scratch_operands = 0 : i64, tpu.core_type = #tpu.core_type<tc>, window_params = [{pipeline_mode = #tpu.pipeline_mode<synchronous>, transform_indices = @transform_0, window_bounds = array<i64: 8, 128>}, {pipeline_mode = #tpu.pipeline_mode<synchronous>, transform_indices = @transform_1, window_bounds = array<i64: 8, 128>}]} {
    %c0 = arith.constant 0 : index
    %c0_0 = arith.constant 0 : index
    %0 = vector.load %arg1[%c0, %c0_0] : memref<8x128xf32, #tpu.memory_space<vmem>>, vector<8x128xf32>
    %c0_1 = arith.constant 0 : index
    %c0_2 = arith.constant 0 : index
    %1 = vector.load %arg2[%c0_1, %c0_2] : memref<8x128xf32, #tpu.memory_space<vmem>>, vector<8x128xf32>
    tpu.vector_store %arg2[%c0_1, %c0_2], %0 {strides = array<i32>} : memref<8x128xf32, #tpu.memory_space<vmem>>, vector<8x128xf32>,
    return
  }
  func.func @transform_0(%arg0: i32) -> (i32, i32) {
    %c0_i32 = arith.constant 0 : i32
    %c0_i32_0 = arith.constant 0 : i32
    %c0_i32_1 = arith.constant 0 : i32
    return %c0_i32, %c0_i32_0 : i32, i32
  }
  func.func @transform_1(%arg0: i32) -> (i32, i32) {
    %c0_i32 = arith.constant 0 : i32
    %c0_i32_0 = arith.constant 0 : i32
    %c0_i32_1 = arith.constant 0 : i32
    return %c0_i32, %c0_i32_0 : i32, i32
  }
}

module attributes {stable_mosaic.version = 11 : i64} {
  func.func @_classifier_kernel(%arg0: i32, %arg1: memref<128x320xbf16, #tpu.memory_space<vmem>>, %arg2: memref<320x128xbf16, #tpu.memory_space<vmem>>, %arg3: memref<1x128xf32, #tpu.memory_space<vmem>>, %arg4: memref<128x128xbf16, #tpu.memory_space<vmem>>, %arg5: memref<1x128xf32, #tpu.memory_space<vmem>>, %arg6: memref<1x1x128xi32, #tpu.memory_space<vmem>>) attributes {dimension_semantics = [#tpu.dimension_semantics<parallel>], iteration_bounds = array<i64: 1>, scalar_prefetch = 0 : i64, scratch_operands = 0 : i64, tpu.core_type = #tpu.core_type<tc>, window_params = [{transform_indices = @transform_0, window_bounds = array<i64: 128, 320>}, {pipeline_mode = #tpu.pipeline_mode<synchronous>, transform_indices = @transform_1, window_bounds = array<i64: 320, 128>}, {pipeline_mode = #tpu.pipeline_mode<synchronous>, transform_indices = @transform_2, window_bounds = array<i64: 1, 128>}, {pipeline_mode = #tpu.pipeline_mode<synchronous>, transform_indices = @transform_3, window_bounds = array<i64: 128, 128>}, {pipeline_mode = #tpu.pipeline_mode<synchronous>, transform_indices = @transform_4, window_bounds = array<i64: 1, 128>}, {transform_indices = @transform_5, window_bounds = array<i64: 1, 1, 128>}]} {
    %c0 = arith.constant 0 : index
    %c0_0 = arith.constant 0 : index
    %0 = vector.load %arg1[%c0, %c0_0] : memref<128x320xbf16, #tpu.memory_space<vmem>>, vector<128x320xbf16>
    %c0_1 = arith.constant 0 : index
    %c0_2 = arith.constant 0 : index
    %1 = vector.load %arg2[%c0_1, %c0_2] : memref<320x128xbf16, #tpu.memory_space<vmem>>, vector<320x128xbf16>
    %cst = arith.constant dense<0.000000e+00> : vector<128x128xf32>
    %2 = tpu.matmul %0, %1, %cst {dimension_numbers = #tpu.dot_dimension_numbers<[1], [0], [0], [1], [0, 0, 1, 1], [], []>} : vector<128x320xbf16>, vector<320x128xbf16>, vector<128x128xf32> -> vector<128x128xf32>
    %c0_3 = arith.constant 0 : index
    %c0_4 = arith.constant 0 : index
    %3 = vector.load %arg3[%c0_3, %c0_4] : memref<1x128xf32, #tpu.memory_space<vmem>>, vector<1x128xf32>
    %4 = vector.broadcast %3 : vector<1x128xf32> to vector<128x128xf32>
    %5 = arith.addf %2, %4 : vector<128x128xf32>
    %cst_5 = arith.constant 0.000000e+00 : f32
    %6 = vector.broadcast %cst_5 : f32 to vector<128x128xf32>
    %7 = arith.maximumf %5, %6 : vector<128x128xf32>
    %8 = arith.truncf %7 : vector<128x128xf32> to vector<128x128xbf16>
    %c0_6 = arith.constant 0 : index
    %c0_7 = arith.constant 0 : index
    %9 = vector.load %arg4[%c0_6, %c0_7] : memref<128x128xbf16, #tpu.memory_space<vmem>>, vector<128x128xbf16>
    %cst_8 = arith.constant dense<0.000000e+00> : vector<128x128xf32>
    %10 = tpu.matmul %8, %9, %cst_8 {dimension_numbers = #tpu.dot_dimension_numbers<[1], [0], [0], [1], [0, 0, 1, 1], [], []>} : vector<128x128xbf16>, vector<128x128xbf16>, vector<128x128xf32> -> vector<128x128xf32>
    %c0_9 = arith.constant 0 : index
    %c0_10 = arith.constant 0 : index
    %11 = vector.load %arg5[%c0_9, %c0_10] : memref<1x128xf32, #tpu.memory_space<vmem>>, vector<1x128xf32>
    %12 = vector.broadcast %11 : vector<1x128xf32> to vector<128x128xf32>
    %13 = arith.addf %10, %12 : vector<128x128xf32>
    %14 = tpu.iota {dimensions = array<i32: 1>} : vector<128x128xi32>
    %cst_11 = arith.constant dense<0xFF800000> : vector<128xf32>
    %15 = vector.multi_reduction <maximumf>, %13, %cst_11 [1] : vector<128x128xf32> to vector<128xf32>
    %16 = vector.shape_cast %15 : vector<128xf32> to vector<128x1xf32>
    %17 = vector.broadcast %16 : vector<128x1xf32> to vector<128x128xf32>
    %18 = arith.cmpf oeq, %13, %17 : vector<128x128xf32>
    %c128_i32 = arith.constant 128 : i32
    %19 = vector.broadcast %c128_i32 : i32 to vector<128x128xi32>
    %20 = arith.select %18, %14, %19 : vector<128x128xi1>, vector<128x128xi32>
    %cst_12 = arith.constant dense<2147483647> : vector<128xi32>
    %21 = vector.multi_reduction <minsi>, %20, %cst_12 [1] : vector<128x128xi32> to vector<128xi32>
    %22 = vector.shape_cast %21 : vector<128xi32> to vector<1x1x128xi32>
    %c0_13 = arith.constant 0 : index
    %c0_14 = arith.constant 0 : index
    %c0_15 = arith.constant 0 : index
    %23 = vector.load %arg6[%c0_13, %c0_14, %c0_15] : memref<1x1x128xi32, #tpu.memory_space<vmem>>, vector<1x1x128xi32>
    tpu.vector_store %arg6[%c0_13, %c0_14, %c0_15], %22 {strides = array<i32>} : memref<1x1x128xi32, #tpu.memory_space<vmem>>, vector<1x1x128xi32>,
    return
  }
  func.func @transform_0(%arg0: i32) -> (i32, i32) {
    %c0_i32 = arith.constant 0 : i32
    %c0_i32_0 = arith.constant 0 : i32
    return %arg0, %c0_i32 : i32, i32
  }
  func.func @transform_1(%arg0: i32) -> (i32, i32) {
    %c0_i32 = arith.constant 0 : i32
    %c0_i32_0 = arith.constant 0 : i32
    %c0_i32_1 = arith.constant 0 : i32
    return %c0_i32, %c0_i32_0 : i32, i32
  }
  func.func @transform_2(%arg0: i32) -> (i32, i32) {
    %c0_i32 = arith.constant 0 : i32
    %c0_i32_0 = arith.constant 0 : i32
    %c0_i32_1 = arith.constant 0 : i32
    return %c0_i32, %c0_i32_0 : i32, i32
  }
  func.func @transform_3(%arg0: i32) -> (i32, i32) {
    %c0_i32 = arith.constant 0 : i32
    %c0_i32_0 = arith.constant 0 : i32
    %c0_i32_1 = arith.constant 0 : i32
    return %c0_i32, %c0_i32_0 : i32, i32
  }
  func.func @transform_4(%arg0: i32) -> (i32, i32) {
    %c0_i32 = arith.constant 0 : i32
    %c0_i32_0 = arith.constant 0 : i32
    %c0_i32_1 = arith.constant 0 : i32
    return %c0_i32, %c0_i32_0 : i32, i32
  }
  func.func @transform_5(%arg0: i32) -> (i32, i32, i32) {
    %c0_i32 = arith.constant 0 : i32
    %c0_i32_0 = arith.constant 0 : i32
    %c0_i32_1 = arith.constant 0 : i32
    return %arg0, %c0_i32, %c0_i32_0 : i32, i32, i32
  }
}

</mosaic_0001>

<bundles_post_ra>
// kernel: tpu_custom_call.1
= control target key start
LH: loop header
LB: loop body
LE: loop exit
PB: predicated region body
PF: predicated region fallthrough
CT: control target
= control target key end

     0   :  { %6 = vsyncpa [#allocation3], 0  ;;  %s102_s0 = inlined_call_operand.hbm [shape: f32[8,128], index: 0, kind: input, shape index: {}]   ;;  %s103_s1 = inlined_call_operand.hbm [shape: f32[8,128], index: 1, kind: output, shape index: {}]  }
   0x1   :  { %7 = vsyncpa [#allocation4], 0  ;;  %s84_s6 = smov [#allocation2]  }
   0x2   :  { %s14_s7 = sshll.u32 %s84_s6, 4  ;;  %s15_s7 = int_to_ptr.vmem [resolvable:$true] %s14_s7 }
   0x3   :  { %s48_s8 = scalar_lea.vmem %s15_s7, 128  ;;  %p53_p1 = scmp.lt.s32.totalorder %s15_s7, %s15_s7 }
   0x4   :  { %p49_p0 = scmp.ne.s32.totalorder %s15_s7, %s48_s8  ;;  %p54_p2 = scmp.lt.s32.totalorder %s48_s8, %s48_s8 }
   0x6   :  { %p55_p3 = por %p54_p2, %p53_p1 }
   0x8   :  { %p56_p4 = pnand %p55_p3, %p49_p0 }
   0xa   :  { %59 = shalt.err (!%p56_p4)
}
   0xb   :  { %17 = dma.hbm_to_vmem [thread:$0]  %s102_s0, 128, %s15_s7, [#allocation3]  }
   0xc   :  { %80 = dma.done.wait [#allocation3], 128  }
   0xd   :  { %81 = vsyncadd [#allocation3], 4294967168  ;;  %s85_s11 = smov [#allocation5]   ;;  %v21_v0 = vld [vmem:[#allocation2] sm:$0xff] }
   0xe   :  { %s29_s12 = sshll.u32 %s85_s11, 4  ;;  %22 = vst [vmem:[#allocation5] sm:$0xff] %v21_v0  ;;  %s30_s12 = int_to_ptr.vmem [resolvable:$true] %s29_s12 }
   0xf   :  { %s60_s13 = scalar_lea.vmem %s30_s12, 128  ;;  %p65_p6 = scmp.lt.s32.totalorder %s30_s12, %s30_s12 }
  0x10   :  { %p61_p5 = scmp.ne.s32.totalorder %s30_s12, %s60_s13  ;;  %p66_p7 = scmp.lt.s32.totalorder %s60_s13, %s60_s13 }
  0x12   :  { %p67_p8 = por %p66_p7, %p65_p6 }
  0x14   :  { %p68_p9 = pnand %p67_p8, %p61_p5 }
  0x16   :  { %71 = shalt.err (!%p68_p9)
}
  0x17   :  { %32 = dma.vmem_to_hbm [thread:$0]  %s30_s12, 128, %s103_s1, [#allocation4]  }
  0x18   :  { %82 = dma.done.wait [#allocation4], 128  }
  0x19   :  { %83 = vsyncadd [#allocation4], 4294967168 }
  0x1a   :  { %36 = vsyncpa [#allocation3], 1 }
  0x1b   :  { %37 = vsyncpa [#allocation4], 1 }

// kernel: tpu_custom_call.1
= control target key start
LH: loop header
LB: loop body
LE: loop exit
PB: predicated region body
PF: predicated region fallthrough
CT: control target
= control target key end

     0   :  { %10 = vsyncpa [#allocation3], 0  ;;  %s1955_s0 = inlined_call_operand.hbm [shape: bf16[10,320], index: 0, kind: input, shape index: {}]   ;;  %s1956_s1 = inlined_call_operand.hbm [shape: bf16[320,128], index: 1, kind: input, shape index: {}]   ;;  %s1957_s2 = inlined_call_operand.vmem [shape: f32[1,128], index: 2, kind: input, shape index: {}]   ;;  %s1958_s3 = inlined_call_operand.hbm [shape: bf16[128,128], index: 3, kind: input, shape index: {}]   ;;  %s1959_s4 = inlined_call_operand.vmem [shape: f32[1,128], index: 4, kind: input, shape index: {}]   ;;  %s1960_s5 = inlined_call_operand.hbm [shape: s32[1,1,128], index: 5, kind: output, shape index: {}]  }
   0x1   :  { %11 = vsyncpa [#allocation6], 0 }
   0x2   :  { %12 = vsyncpa [#allocation4], 0 }
   0x3   :  { %17 = vsyncadd [#allocation3], 2688  ;;  %s1573_s18 = smov [#allocation5]  }
   0x4   :  { %s30_s19 = sshll.u32 %s1573_s18, 4  ;;  %s31_s19 = int_to_ptr.vmem [resolvable:$true] %s30_s19 }
   0x5   :  { %s1495_s20 = scalar_lea.vmem %s31_s19, 2560  ;;  %p1500_p1 = scmp.lt.s32.totalorder %s31_s19, %s31_s19 }
   0x6   :  { %p1496_p0 = scmp.ne.s32.totalorder %s31_s19, %s1495_s20  ;;  %p1501_p2 = scmp.lt.s32.totalorder %s1495_s20, %s1495_s20 }
   0x8   :  { %p1502_p3 = por %p1501_p2, %p1500_p1 }
   0xa   :  { %p1503_p4 = pnand %p1502_p3, %p1496_p0 }
   0xc   :  { %1506 = shalt.err (!%p1503_p4)
}
   0xd   :  { %s1574_s21 = smov 64   ;;  %s1575_s22 = smov 4  }
   0xe   :  { %36 = dma.hbm_to_vmem [thread:$0]  %s1956_s1, 2560, %s31_s19, [#allocation6], %s1574_s21, %s1574_s21, %s1575_s22  }
   0xf   :  { %s1576_s25 = smov [#allocation2]  }
  0x10   :  { %s18_s26 = sshll.u32 %s1576_s25, 4  ;;  %s19_s26 = int_to_ptr.vmem [resolvable:$true] %s18_s26 }
  0x11   :  { %s1515_s27 = scalar_lea.vmem %s19_s26, 384  ;;  %s1519_s28 = scalar_lea.vmem %s19_s26, 3072 }
  0x12   :  { %p1516_p5 = scmp.ne.s32.totalorder %s19_s26, %s1515_s27  ;;  %p1520_p6 = scmp.lt.s32.totalorder %s19_s26, %s19_s26 }
  0x13   :  { %p1521_p7 = scmp.lt.s32.totalorder %s1519_s28, %s1515_s27 }
  0x15   :  { %p1522_p8 = por %p1521_p7, %p1520_p6 }
  0x17   :  { %p1523_p9 = pnand %p1522_p8, %p1516_p5 }
  0x19   :  { %1526 = shalt.err (!%p1523_p9)
}
  0x1a   :  { %s1577_s29 = smov 192   ;;  %s1578_s30 = smov 12  }
  0x1b   :  { %24 = dma.hbm_to_vmem [thread:$0]  %s1955_s0, 384, %s19_s26, [#allocation3], %s1577_s29, %s1577_s29, %s1578_s30  }
  0x1c   :  { %s1579_s8 = smov [#allocation7]  }
  0x1d   :  { %s44_s9 = sshll.u32 %s1579_s8, 4  ;;  %s45_s9 = int_to_ptr.vmem [resolvable:$true] %s44_s9 }
  0x1e   :  { %s1535_s1 = scalar_lea.vmem %s45_s9, 1024  ;;  %p1540_p11 = scmp.lt.s32.totalorder %s45_s9, %s45_s9 }
  0x1f   :  { %p1536_p10 = scmp.ne.s32.totalorder %s45_s9, %s1535_s1  ;;  %p1541_p12 = scmp.lt.s32.totalorder %s1535_s1, %s1535_s1 }
  0x21   :  { %p1542_p13 = por %p1541_p12, %p1540_p11 }
  0x23   :  { %p1543_p0 = pnand %p1542_p13, %p1536_p10 }
  0x25   :  { %1546 = shalt.err (!%p1543_p0)
}
  0x26   :  { %50 = dma.hbm_to_vmem [thread:$0]  %s1958_s3, 1024, %s45_s9, [#allocation6], %s1574_s21, %s1574_s21, %s1575_s22  }
  0x27   :  { %1567 = dma.done.wait [#allocation3], 3072  }
  0x28   :  { %1568 = vsyncadd [#allocation3], 4294964224 }
  0x29   :  { %1569 = dma.done.wait [#allocation6], 3584  }
  0x2a   :  { %1570 = vsyncadd [#allocation6], 4294963712  ;;  %v1427_v0 = vld [vmem:[#allocation5 + $0x78] sm:$0xff]   ;;  %v1429_v2 = vld [vmem:[#allocation5 + $0x70] sm:$0xff]   ;;  %vm382_vm0 = vcmask 523264  }
  0x2b   :  { %v1428_v1 = vld [vmem:[#allocation5 + $0x38] sm:$0xff]   ;;  %1271 = vmatprep.subr.bf16.mxu0 %v1427_v0  ;;  %v1430_v3 = vld [vmem:[#allocation5 + $0x30] sm:$0xff]   ;;  %v1431_v4 = vld [vmem:[#allocation5 + $0x68] sm:$0xff]  }
  0x2c   :  { %1272 = vmatpush3.bf16.msra.mxu0 %v1428_v1  ;;  %v1432_v5 = vld [vmem:[#allocation5 + $0x28] sm:$0xff]   ;;  %v1433_v6 = vld [vmem:[#allocation5 + $0x60] sm:$0xff]   ;;  %v1438_v8 = vld [vmem:[#allocation5 + $0x98] sm:$0xff]  }
  0x2d   :  { %1273 = vmatprep.subr.bf16.mxu0 %v1429_v2  ;;  %v1434_v7 = vld [vmem:[#allocation5 + $0x20] sm:$0xff]   ;;  %v1435_v9 = vld [vmem:[#allocation5 + $0x58] sm:$0xff]   ;;  %1363 = vmatprep.subr.bf16.mxu1 %v1438_v8  ;;  %v1441_v10 = vld [vmem:[#allocation5 + $0x90] sm:$0xff]  }
  0x2e   :  { %1364 = vmatpush3.bf16.msra.mxu1 %v1438_v8  ;;  %v1436_v11 = vld [vmem:[#allocation5 + $0x18] sm:$0xff]   ;;  %v1437_v12 = vld [vmem:[#allocation5 + $0x50] sm:$0xff]   ;;  %v1444_v13 = vld [vmem:[#allocation5 + $0x88] sm:$0xff]  }
  0x2f   :  { %1365 = vmatprep.subr.bf16.mxu1 %v1441_v10  ;;  %v1439_v14 = vld [vmem:[#allocation5 + $0x10] sm:$0xff]   ;;  %v1440_v15 = vld [vmem:[#allocation5 + $0x48] sm:$0xff]   ;;  %v1449_v17 = vld [vmem:[#allocation5 + $0x80] sm:$0xff]  }
  0x30   :  { %1274 = vmatpush3.bf16.msra.mxu0 %v1430_v3  ;;  %v1448_v16 = vld [vmem:[#allocation2 + $0x4] ss:$12 sps:$4 sm:$0xff]   ;;  %v1450_v18 = vld [vmem:[#allocation2 + $0x8] ss:$12 sps:$4 sm:$0xff]   ;;  %v1451_v21 = vld [vmem:[#allocation2 + $0x20] ss:$12 sps:$4 sm:$0xff]  }
  0x31   :  { %1275 = vmatprep.subr.bf16.mxu0 %v1431_v4  ;;  %439 = vmatprep.mubr.bf16.mxu0 %v1448_v16  ;;  %v1442_v19 = vld [vmem:[#allocation5 + $0x8] sm:$0xff]   ;;  %v1443_v20 = vld [vmem:[#allocation5 + $0x40] sm:$0xff]   ;;  %v1459_v26 = vld [vmem:[#allocation2 + $0x50] ss:$12 sps:$4 sm:$0xff]  }
  0x32   :  { %1366 = vmatpush3.bf16.msra.mxu1 %v1441_v10  ;;  %1371 = vmatprep.mubr.msk.bf16.mxu1 %vm382_vm0, %v1450_v18  ;;  %v1458_v22 = vld [vmem:[#allocation2 + $0x38] ss:$12 sps:$4 sm:$0xff]   ;;  %v1446_v24 = vld [vmem:[#allocation2] ss:$12 sps:$4 sm:$0xff]   ;;  %v1452_v25 = vld [vmem:[#allocation2 + $0x1c] ss:$12 sps:$4 sm:$0xff]  }
  0x33   :  { %1367 = vmatprep.subr.bf16.mxu1 %v1444_v13  ;;  %v1445_v23 = vld [vmem:[#allocation5] sm:$0xff]   ;;  %v1466_v27 = vld [vmem:[#allocation2 + $0x68] ss:$12 sps:$4 sm:$0xff]   ;;  %v1479_v31 = vld [vmem:[#allocation7 + $0x38] sm:$0xff]  }
  0x34   :  { %1276 = vmatpush3.bf16.msra.mxu0 %v1432_v5  ;;  %v1454_v28 = vld [vmem:[#allocation2 + $0x18] ss:$12 sps:$4 sm:$0xff]   ;;  %v1455_v29 = vld [vmem:[#allocation2 + $0x34] ss:$12 sps:$4 sm:$0xff]   ;;  %v1457_v34 = vld [vmem:[#allocation2 + $0x30] ss:$12 sps:$4 sm:$0xff]  }
  0x35   :  { %1277 = vmatprep.subr.bf16.mxu0 %v1433_v6  ;;  %v1467_v30 = vld [vmem:[#allocation2 + $0x80] ss:$12 sps:$4 sm:$0xff]   ;;  %v1474_v32 = vld [vmem:[#allocation2 + $0x98] ss:$12 sps:$4 sm:$0xff]   ;;  %v1480_v33 = vld [vmem:[#allocation7 + $0x30] sm:$0xff]  }
  0x36   :  { %1368 = vmatpush3.bf16.msra.mxu1 %v1444_v13  ;;  %v1460_v35 = vld [vmem:[#allocation2 + $0x4c] ss:$12 sps:$4 sm:$0xff]   ;;  %v1475_v36 = vld [vmem:[#allocation2 + $0xb0] ss:$12 sps:$4 sm:$0xff]   ;;  %v1462_v37 = vld [vmem:[#allocation2 + $0x48] ss:$12 sps:$4 sm:$0xff]  }
  0x37   :  { %1369 = vmatprep.subr.bf16.mxu1 %v1449_v17  ;;  %v1463_v38 = vld [vmem:[#allocation2 + $0x64] ss:$12 sps:$4 sm:$0xff]   ;;  %v1465_v39 = vld [vmem:[#allocation2 + $0x60] ss:$12 sps:$4 sm:$0xff]   ;;  %v1468_v40 = vld [vmem:[#allocation2 + $0x7c] ss:$12 sps:$4 sm:$0xff]  }
  0x38   :  { %1278 = vmatpush3.bf16.msra.mxu0 %v1434_v7  ;;  %v1470_v41 = vld [vmem:[#allocation2 + $0x78] ss:$12 sps:$4 sm:$0xff]   ;;  %v1471_v42 = vld [vmem:[#allocation2 + $0x94] ss:$12 sps:$4 sm:$0xff]   ;;  %v1473_v43 = vld [vmem:[#allocation2 + $0x90] ss:$12 sps:$4 sm:$0xff]  }
  0x39   :  { %1279 = vmatprep.subr.bf16.mxu0 %v1435_v9  ;;  %v1476_v44 = vld [vmem:[#allocation2 + $0xac] ss:$12 sps:$4 sm:$0xff]   ;;  %v1478_v45 = vld [vmem:[#allocation2 + $0xa8] ss:$12 sps:$4 sm:$0xff]   ;;  %v1482_v47 = vld [vmem:[#allocation7 + $0x20] sm:$0xff]  }
  0x3a   :  { %1370 = vmatpush3.bf16.msra.mxu1 %v1449_v17  ;;  %v1481_v46 = vld [vmem:[#allocation7 + $0x28] sm:$0xff]   ;;  %v1483_v48 = vld [vmem:[#allocation7 + $0x18] sm:$0xff]   ;;  %v1484_v49 = vld [vmem:[#allocation7 + $0x10] sm:$0xff]  }
  0x3b   :  { %1387 = vmatprep.subr.bf16.mxu1 %v1479_v31  ;;  %v1485_v50 = vld [vmem:[#allocation7 + $0x8] sm:$0xff]   ;;  %v1486_v51 = vld [vmem:[#allocation7] sm:$0xff]  }
  0x3c   :  { %1280 = vmatpush3.bf16.msra.mxu0 %v1436_v11  ;;  %v1637_v56 = vld [vmem:[%s1957_s2] ss:$0 sm:$0xff] }
  0x3d   :  { %1281 = vmatprep.subr.bf16.mxu0 %v1437_v12  ;;  %1372 = vmatmul.mubr.msk.bf16.vlgmr.msra.gmra.mxu1 %vm382_vm0, %v1451_v21 }
  0x3e   :  { %1375 = vmatprep.mubr.msk.bf16.mxu1 %vm382_vm0, %v1458_v22  ;;  %1388 = vmatpush3.bf16.msra.mxu1 %v1479_v31 }
  0x3f   :  { %1389 = vmatprep.subr.bf16.mxu1 %v1480_v33 }
  0x40   :  { %1282 = vmatpush3.bf16.msra.mxu0 %v1439_v14 }
  0x41   :  { %1283 = vmatprep.subr.bf16.mxu0 %v1440_v15 }
  0x42   :  { %1390 = vmatpush3.bf16.msra.mxu1 %v1480_v33 }
  0x43   :  { %1391 = vmatprep.subr.bf16.mxu1 %v1481_v46 }
  0x44   :  { %1284 = vmatpush3.bf16.msra.mxu0 %v1442_v19 }
  0x45   :  { %1285 = vmatprep.subr.bf16.mxu0 %v1443_v20  ;;  %1376 = vmatmul.mubr.msk.bf16.gmra.mxu1 %vm382_vm0, %v1459_v26 }
  0x46   :  { %1379 = vmatprep.mubr.msk.bf16.mxu1 %vm382_vm0, %v1466_v27  ;;  %1392 = vmatpush3.bf16.msra.mxu1 %v1481_v46 }
  0x47   :  { %1393 = vmatprep.subr.bf16.mxu1 %v1482_v47 }
  0x48   :  { %1286 = vmatpush3.bf16.msra.mxu0 %v1445_v23 }
  0x4a   :  { %1394 = vmatpush3.bf16.msra.mxu1 %v1482_v47 }
  0x4b   :  { %440 = vmatmul.mubr.bf16.vlgmr.msra.gmra.mxu0 %v1446_v24  ;;  %1395 = vmatprep.subr.bf16.mxu1 %v1483_v48 }
  0x4c   :  { %447 = vmatprep.mubr.bf16.mxu0 %v1452_v25 }
  0x4d   :  { %1380 = vmatmul.mubr.msk.bf16.gmra.mxu1 %vm382_vm0, %v1467_v30 }
  0x4e   :  { %1383 = vmatprep.mubr.msk.bf16.mxu1 %vm382_vm0, %v1474_v32  ;;  %1396 = vmatpush3.bf16.msra.mxu1 %v1483_v48 }
  0x4f   :  { %1397 = vmatprep.subr.bf16.mxu1 %v1484_v49 }
  0x52   :  { %1398 = vmatpush3.bf16.msra.mxu1 %v1484_v49 }
  0x53   :  { %448 = vmatmul.mubr.bf16.gmra.mxu0 %v1454_v28  ;;  %1399 = vmatprep.subr.bf16.mxu1 %v1485_v50 }
  0x54   :  { %455 = vmatprep.mubr.bf16.mxu0 %v1455_v29 }
  0x55   :  { %1384 = vmatmul.mubr.msk.bf16.gmra.mxu1 %vm382_vm0, %v1475_v36 }
  0x56   :  { %1400 = vmatpush3.bf16.msra.mxu1 %v1485_v50 }
  0x57   :  { %1401 = vmatprep.subr.bf16.mxu1 %v1486_v51 }
  0x5a   :  { %1402 = vmatpush3.bf16.msra.mxu1 %v1486_v51 }
  0x5b   :  { %456 = vmatmul.mubr.bf16.gmra.mxu0 %v1457_v34 }
  0x5c   :  { %463 = vmatprep.mubr.bf16.mxu0 %v1460_v35 }
  0x63   :  { %464 = vmatmul.mubr.bf16.gmra.mxu0 %v1462_v37 }
  0x64   :  { %471 = vmatprep.mubr.bf16.mxu0 %v1463_v38 }
  0x6b   :  { %472 = vmatmul.mubr.bf16.gmra.mxu0 %v1465_v39 }
  0x6c   :  { %479 = vmatprep.mubr.bf16.mxu0 %v1468_v40 }
  0x73   :  { %480 = vmatmul.mubr.bf16.gmra.mxu0 %v1470_v41 }
  0x74   :  { %487 = vmatprep.mubr.bf16.mxu0 %v1471_v42 }
  0x7b   :  { %488 = vmatmul.mubr.bf16.gmra.mxu0 %v1473_v43 }
  0x7c   :  { %495 = vmatprep.mubr.bf16.mxu0 %v1476_v44 }
  0x83   :  { %496 = vmatmul.mubr.bf16.gmra.mxu0 %v1478_v45 }
  0xfd   :  { %v1373_v52 = vpop.f32.mrf.mxu1 }
  0xff   :  { %v538_v54 = vpop.f32.mrf.mxu1 }
 0x101   :  { %v1374_v59 = vpop.f32.mrf.mxu1 }
 0x103   :  { %v541_v0 = vpop.f32.mrf.mxu1 }
 0x105   :  { %v1377_v7 = vpop.f32.mrf.mxu1 }
 0x107   :  { %v554_v15 = vpop.f32.mrf.mxu1 }
 0x109   :  { %v1378_v22 = vpop.f32.mrf.mxu1 }
 0x10b   :  { %v1287_v53 = vpop.f32.mrf.mxu0  ;;  %v557_v30 = vpop.f32.mrf.mxu1 }
 0x10d   :  { %v1288_v55 = vpop.f32.mrf.mxu0  ;;  %v1381_v37 = vpop.f32.mrf.mxu1 }
 0x10e   :  { %v1289_v57 = vadd.f32 %v1288_v55, %v1287_v53 }
 0x10f   :  { %v1290_v58 = vpop.f32.mrf.mxu0  ;;  %v570_v45 = vpop.f32.mrf.mxu1 }
 0x110   :  { %v442_v60 = vadd.f32 %v1289_v57, %v1637_v56 }
 0x111   :  { %v1291_v61 = vpop.f32.mrf.mxu0 }
 0x112   :  { %v1292_v62 = vadd.f32 %v1291_v61, %v1290_v58  ;;  %v539_v1 = vadd.f32 %v538_v54, %v442_v60 }
 0x113   :  { %v1293_v63 = vpop.f32.mrf.mxu0 }
 0x114   :  { %v445_v2 = vadd.f32 %v1292_v62, %v1637_v56  ;;  %v601_v8 = vmax.f32 %v539_v1, 0.0 }
 0x115   :  { %v1294_v3 = vpop.f32.mrf.mxu0 }
 0x116   :  { %v1295_v4 = vadd.f32 %v1294_v3, %v1293_v63  ;;  %v542_v5 = vadd.f32 %v541_v0, %v445_v2 }
 0x117   :  { %v1296_v6 = vpop.f32.mrf.mxu0 }
 0x118   :  { %v450_v9 = vadd.f32 %v1295_v4, %v1637_v56  ;;  %v602_v10 = vmax.f32 %v542_v5, 0.0 }
 0x119   :  { %v1297_v11 = vpop.f32.mrf.mxu0 }
 0x11a   :  { %v617_v12 = vpack.c.bf16 %v602_v10, %v601_v8  ;;  %v1298_v13 = vadd.f32 %v1297_v11, %v1296_v6  ;;  %v547_v16 = vadd.f32 %v1373_v52, %v450_v9  ;;  %v1382_v52 = vpop.f32.mrf.mxu1 }
 0x11b   :  { %v1299_v14 = vpop.f32.mrf.mxu0 }
 0x11c   :  { %v453_v17 = vadd.f32 %v1298_v13, %v1637_v56  ;;  %1403 = vmatprep.mubr.bf16.mxu1 %v617_v12  ;;  %v603_v23 = vmax.f32 %v547_v16, 0.0  ;;  %v573_v61 = vpop.f32.mrf.mxu1 }
 0x11d   :  { %v1300_v18 = vpop.f32.mrf.mxu0 }
 0x11e   :  { %v550_v19 = vadd.f32 %v1374_v59, %v453_v17  ;;  %v1301_v20 = vadd.f32 %v1300_v18, %v1299_v14  ;;  %v1385_v4 = vpop.f32.mrf.mxu1 }
 0x11f   :  { %v1302_v21 = vpop.f32.mrf.mxu0 }
 0x120   :  { %v604_v24 = vmax.f32 %v550_v19, 0.0  ;;  %v458_v25 = vadd.f32 %v1301_v20, %v1637_v56  ;;  %v586_v12 = vpop.f32.mrf.mxu1 }
 0x121   :  { %v1303_v26 = vpop.f32.mrf.mxu0 }
 0x122   :  { %v618_v27 = vpack.c.bf16 %v604_v24, %v603_v23  ;;  %v1304_v28 = vadd.f32 %v1303_v26, %v1302_v21  ;;  %v555_v31 = vadd.f32 %v554_v15, %v458_v25  ;;  %v1386_v19 = vpop.f32.mrf.mxu1 }
 0x123   :  { %v1305_v29 = vpop.f32.mrf.mxu0 }
 0x124   :  { %1404 = vmatmul.mubr.bf16.vlgmr.msra.gmra.mxu1 %v618_v27  ;;  %v461_v32 = vadd.f32 %v1304_v28, %v1637_v56  ;;  %v605_v38 = vmax.f32 %v555_v31, 0.0  ;;  %v589_v27 = vpop.f32.mrf.mxu1 }
 0x125   :  { %v1306_v33 = vpop.f32.mrf.mxu0 }
 0x126   :  { %v1307_v34 = vadd.f32 %v1306_v33, %v1305_v29  ;;  %v558_v35 = vadd.f32 %v557_v30, %v461_v32 }
 0x127   :  { %v1308_v36 = vpop.f32.mrf.mxu0 }
 0x128   :  { %v466_v39 = vadd.f32 %v1307_v34, %v1637_v56  ;;  %v606_v40 = vmax.f32 %v558_v35, 0.0 }
 0x129   :  { %v1309_v41 = vpop.f32.mrf.mxu0 }
 0x12a   :  { %v619_v42 = vpack.c.bf16 %v606_v40, %v605_v38  ;;  %v1310_v43 = vadd.f32 %v1309_v41, %v1308_v36  ;;  %v563_v46 = vadd.f32 %v1377_v7, %v466_v39 }
 0x12b   :  { %v1311_v44 = vpop.f32.mrf.mxu0 }
 0x12c   :  { %v469_v47 = vadd.f32 %v1310_v43, %v1637_v56  ;;  %1407 = vmatprep.mubr.bf16.mxu1 %v619_v42  ;;  %v607_v53 = vmax.f32 %v563_v46, 0.0  ;;  %v1262_v46 = vld [vmem:[%s1959_s4] ss:$0 sm:$0xff]  ;;  %s1580_s4 = smov [#allocation8]  }
 0x12d   :  { %v1312_v48 = vpop.f32.mrf.mxu0  ;;  %s1199_s13 = sshll.u32 %s1580_s4, 4  ;;  %s1200_s13 = int_to_ptr.vmem [resolvable:$true] %s1199_s13 }
 0x12e   :  { %v566_v49 = vadd.f32 %v1378_v22, %v469_v47  ;;  %v1313_v50 = vadd.f32 %v1312_v48, %v1311_v44  ;;  %s1547_s14 = scalar_lea.vmem %s1200_s13, 16  ;;  %s1551_s15 = scalar_lea.vmem %s1200_s13, 32 }
 0x12f   :  { %v1314_v51 = vpop.f32.mrf.mxu0  ;;  %p1548_p1 = scmp.ne.s32.totalorder %s1200_s13, %s1547_s14  ;;  %p1552_p2 = scmp.lt.s32.totalorder %s1200_s13, %s1200_s13 }
 0x130   :  { %v608_v54 = vmax.f32 %v566_v49, 0.0  ;;  %v474_v55 = vadd.f32 %v1313_v50, %v1637_v56  ;;  %p1553_p3 = scmp.lt.s32.totalorder %s1551_s15, %s1547_s14 }
 0x131   :  { %v1315_v57 = vpop.f32.mrf.mxu0 }
 0x132   :  { %v1316_v58 = vadd.f32 %v1315_v57, %v1314_v51  ;;  %v620_v59 = vpack.c.bf16 %v608_v54, %v607_v53  ;;  %v571_v62 = vadd.f32 %v570_v45, %v474_v55  ;;  %p1554_p4 = por %p1553_p3, %p1552_p2 }
 0x133   :  { %v1317_v60 = vpop.f32.mrf.mxu0 }
 0x134   :  { %1408 = vmatmul.mubr.bf16.gmra.mxu1 %v620_v59  ;;  %v477_v63 = vadd.f32 %v1316_v58, %v1637_v56  ;;  %v609_v5 = vmax.f32 %v571_v62, 0.0  ;;  %p1555_p5 = pnand %p1554_p4, %p1548_p1 }
 0x135   :  { %v1318_v0 = vpop.f32.mrf.mxu0 }
 0x136   :  { %v1319_v1 = vadd.f32 %v1318_v0, %v1317_v60  ;;  %v574_v2 = vadd.f32 %v573_v61, %v477_v63 }
 0x137   :  { %v1320_v3 = vpop.f32.mrf.mxu0 }
 0x138   :  { %v482_v6 = vadd.f32 %v1319_v1, %v1637_v56  ;;  %v610_v7 = vmax.f32 %v574_v2, 0.0 }
 0x139   :  { %v1321_v8 = vpop.f32.mrf.mxu0 }
 0x13a   :  { %v621_v9 = vpack.c.bf16 %v610_v7, %v609_v5  ;;  %v1322_v10 = vadd.f32 %v1321_v8, %v1320_v3  ;;  %v579_v13 = vadd.f32 %v1381_v37, %v482_v6 }
 0x13b   :  { %v1323_v11 = vpop.f32.mrf.mxu0 }
 0x13c   :  { %v485_v14 = vadd.f32 %v1322_v10, %v1637_v56  ;;  %1411 = vmatprep.mubr.bf16.mxu1 %v621_v9  ;;  %v611_v20 = vmax.f32 %v579_v13, 0.0 }
 0x13d   :  { %v1324_v15 = vpop.f32.mrf.mxu0 }
 0x13e   :  { %v582_v16 = vadd.f32 %v1382_v52, %v485_v14  ;;  %v1325_v17 = vadd.f32 %v1324_v15, %v1323_v11  ;;  %v793_v15 = vlaneseq }
 0x13f   :  { %v1326_v18 = vpop.f32.mrf.mxu0 }
 0x140   :  { %v612_v21 = vmax.f32 %v582_v16, 0.0  ;;  %v490_v22 = vadd.f32 %v1325_v17, %v1637_v56  ;;  %v1695_v16 = vand.u32 127, %v793_v15 }
 0x141   :  { %v1327_v23 = vpop.f32.mrf.mxu0 }
 0x142   :  { %v1328_v24 = vadd.f32 %v1327_v23, %v1326_v18  ;;  %v622_v25 = vpack.c.bf16 %v612_v21, %v611_v20  ;;  %v587_v28 = vadd.f32 %v586_v12, %v490_v22 }
 0x143   :  { %v1329_v26 = vpop.f32.mrf.mxu0 }
 0x144   :  { %1412 = vmatmul.mubr.bf16.gmra.mxu1 %v622_v25  ;;  %v493_v29 = vadd.f32 %v1328_v24, %v1637_v56  ;;  %v613_v34 = vmax.f32 %v587_v28, 0.0 }
 0x145   :  { %v1330_v30 = vpop.f32.mrf.mxu0 }
 0x146   :  { %v1331_v31 = vadd.f32 %v1330_v30, %v1329_v26  ;;  %v590_v32 = vadd.f32 %v589_v27, %v493_v29 }
 0x147   :  { %v1332_v33 = vpop.f32.mrf.mxu0 }
 0x148   :  { %v498_v35 = vadd.f32 %v1331_v31, %v1637_v56  ;;  %v614_v36 = vmax.f32 %v590_v32, 0.0 }
 0x149   :  { %v1333_v37 = vpop.f32.mrf.mxu0 }
 0x14a   :  { %v623_v38 = vpack.c.bf16 %v614_v36, %v613_v34  ;;  %v1334_v39 = vadd.f32 %v1333_v37, %v1332_v33  ;;  %v595_v40 = vadd.f32 %v1385_v4, %v498_v35 }
 0x14c   :  { %v501_v41 = vadd.f32 %v1334_v39, %v1637_v56  ;;  %1415 = vmatprep.mubr.bf16.mxu1 %v623_v38  ;;  %v615_v43 = vmax.f32 %v595_v40, 0.0 }
 0x14e   :  { %v598_v42 = vadd.f32 %v1386_v19, %v501_v41 }
 0x150   :  { %v616_v44 = vmax.f32 %v598_v42, 0.0 }
 0x152   :  { %v624_v45 = vpack.c.bf16 %v616_v44, %v615_v43 }
 0x154   :  { %1416 = vmatmul.mubr.bf16.gmra.mxu1 %v624_v45 }
 0x1e4   :  { %v1405_v47 = vpop.f32.mrf.mxu1 }
 0x1e5   :  { %v739_v48 = vadd.f32 %v1405_v47, %v1262_v46 }
 0x1e6   :  { %v730_v49 = vpop.f32.mrf.mxu1 }
 0x1e7   :  { %v731_v50 = vadd.f32 %v1262_v46, %v730_v49  ;;  %799 = vmax.xlane.f32.xlu1 %v739_v48 }
 0x1e8   :  { %v1406_v51 = vpop.f32.mrf.mxu1 }
 0x1e9   :  { %v742_v52 = vadd.f32 %v1406_v51, %v1262_v46  ;;  %795 = vmax.xlane.f32.xlu0 %v731_v50 }
 0x1ea   :  { %v733_v53 = vpop.f32.mrf.mxu1 }
 0x1eb   :  { %v734_v56 = vadd.f32 %v1262_v46, %v733_v53  ;;  %801 = vmax.xlane.f32.xlu1 %v742_v52 }
 0x1ed   :  { %797 = vmax.xlane.f32.xlu0 %v734_v56 }
 0x1f4   :  { %v1409_v54 = vpop.f32.mrf.mxu1 }
 0x1f5   :  { %v1658_v55 = vadd.f32 %v1409_v54, %v1262_v46 }
 0x1f6   :  { %v746_v57 = vpop.f32.mrf.mxu1 }
 0x1f7   :  { %807 = vmax.xlane.f32.xlu0 %v1658_v55  ;;  %v1661_v59 = vadd.f32 %v1262_v46, %v746_v57 }
 0x1f8   :  { %v1410_v58 = vpop.f32.mrf.mxu1 }
 0x1f9   :  { %v1663_v60 = vadd.f32 %v1410_v58, %v1262_v46 }
 0x1fa   :  { %v749_v61 = vpop.f32.mrf.mxu1 }
 0x1fb   :  { %809 = vmax.xlane.f32.xlu1 %v1663_v60  ;;  %803 = vmax.xlane.f32.xlu0 %v1661_v59  ;;  %v1667_v62 = vadd.f32 %v1262_v46, %v749_v61 }
 0x1ff   :  { %805 = vmax.xlane.f32.xlu1 %v1667_v62 }
 0x204   :  { %v1413_v63 = vpop.f32.mrf.mxu1 }
 0x205   :  { %v1670_v0 = vadd.f32 %v1413_v63, %v1262_v46 }
 0x206   :  { %v762_v1 = vpop.f32.mrf.mxu1 }
 0x207   :  { %815 = vmax.xlane.f32.xlu0 %v1670_v0  ;;  %v1673_v3 = vadd.f32 %v1262_v46, %v762_v1 }
 0x208   :  { %v1414_v2 = vpop.f32.mrf.mxu1 }
 0x209   :  { %v1675_v4 = vadd.f32 %v1414_v2, %v1262_v46 }
 0x20a   :  { %v765_v5 = vpop.f32.mrf.mxu1 }
 0x20b   :  { %817 = vmax.xlane.f32.xlu1 %v1675_v4  ;;  %811 = vmax.xlane.f32.xlu0 %v1673_v3  ;;  %v1679_v6 = vadd.f32 %v1262_v46, %v765_v5 }
 0x20f   :  { %813 = vmax.xlane.f32.xlu1 %v1679_v6 }
 0x214   :  { %v1417_v7 = vpop.f32.mrf.mxu1 }
 0x215   :  { %v1685_v12 = vadd.f32 %v1417_v7, %v1262_v46 }
 0x216   :  { %v778_v8 = vpop.f32.mrf.mxu1 }
 0x217   :  { %v1682_v9 = vadd.f32 %v1262_v46, %v778_v8 }
 0x218   :  { %v1418_v10 = vpop.f32.mrf.mxu1 }
 0x219   :  { %819 = vmax.xlane.f32.xlu0 %v1682_v9  ;;  %v1691_v14 = vadd.f32 %v1418_v10, %v1262_v46 }
 0x21a   :  { %v781_v11 = vpop.f32.mrf.mxu1 }
 0x21b   :  { %v1687_v13 = vadd.f32 %v1262_v46, %v781_v11 }
 0x21d   :  { %821 = vmax.xlane.f32.xlu1 %v1687_v13  ;;  %823 = vmax.xlane.f32.xlu0 %v1685_v12 }
 0x221   :  { %825 = vmax.xlane.f32.xlu1 %v1691_v14 }
 0x270   :  { %v800_v17 = vpop.xlane.xlu1 %799 }
 0x271   :  { %vm829_vm1 = vcmp.eq.f32.partialorder %v739_v48, %v800_v17 }
 0x272   :  { %v1698_v18 = vsel %vm829_vm1, %v1695_v16, 128  ;;  %v796_v19 = vpop.xlane.xlu0 %795 }
 0x273   :  { %vm827_vm2 = vcmp.eq.f32.partialorder %v731_v50, %v796_v19  ;;  %v888_v20 = vshra.s32 %v1698_v18, 16 }
 0x274   :  { %v1702_v21 = vsel %vm827_vm2, %v1695_v16, 128  ;;  %v802_v22 = vpop.xlane.xlu1 %801 }
 0x275   :  { %vm830_vm3 = vcmp.eq.f32.partialorder %v742_v52, %v802_v22  ;;  %v1704_v23 = vcvt.s32.f32 %v888_v20  ;;  %v860_v24 = vshra.s32 %v1702_v21, 16  ;;  %v887_v22 = vand.u32 65535, %v1698_v18 }
 0x276   :  { %v1708_v25 = vsel %vm830_vm3, %v1695_v16, 128  ;;  %v798_v26 = vpop.xlane.xlu0 %797 }
 0x277   :  { %vm828_vm4 = vcmp.eq.f32.partialorder %v734_v56, %v798_v26  ;;  %891 = vmin.xlane.f32.xlu0 %v1704_v23  ;;  %v902_v27 = vshra.s32 %v1708_v25, 16  ;;  %v1717_v30 = vcvt.s32.f32 %v860_v24  ;;  %v901_v24 = vand.u32 65535, %v1708_v25 }
 0x278   :  { %v1713_v28 = vsel %vm828_vm4, %v1695_v16, 128 }
 0x279   :  { %v1715_v29 = vcvt.s32.f32 %v902_v27  ;;  %v874_v31 = vshra.s32 %v1713_v28, 16  ;;  %v889_v27 = vcvt.s32.f32 %v887_v22 }
 0x27b   :  { %905 = vmin.xlane.f32.xlu1 %v1715_v29  ;;  %863 = vmin.xlane.f32.xlu0 %v1717_v30  ;;  %v1722_v32 = vcvt.s32.f32 %v874_v31 }
 0x27f   :  { %877 = vmin.xlane.f32.xlu1 %v1722_v32 }
 0x280   :  { %v808_v33 = vpop.xlane.xlu0 %807 }
 0x281   :  { %vm833_vm5 = vcmp.eq.f32.partialorder %v1658_v55, %v808_v33  ;;  %v873_v33 = vand.u32 65535, %v1713_v28 }
 0x282   :  { %v1727_v34 = vsel %vm833_vm5, %v1695_v16, 128 }
 0x283   :  { %v944_v35 = vshra.s32 %v1727_v34, 16 }
 0x284   :  { %v810_v36 = vpop.xlane.xlu1 %809  ;;  %v804_v37 = vpop.xlane.xlu0 %803 }
 0x285   :  { %vm834_vm6 = vcmp.eq.f32.partialorder %v1663_v60, %v810_v36  ;;  %vm831_vm7 = vcmp.eq.f32.partialorder %v1661_v59, %v804_v37  ;;  %v1732_v38 = vcvt.s32.f32 %v944_v35  ;;  %v903_v37 = vcvt.s32.f32 %v901_v24 }
 0x286   :  { %v1735_v39 = vsel %vm834_vm6, %v1695_v16, 128  ;;  %v1738_v40 = vsel %vm831_vm7, %v1695_v16, 128 }
 0x287   :  { %947 = vmin.xlane.f32.xlu0 %v1732_v38  ;;  %v958_v41 = vshra.s32 %v1735_v39, 16  ;;  %v916_v42 = vshra.s32 %v1738_v40, 16 }
 0x288   :  { %v806_v43 = vpop.xlane.xlu1 %805 }
 0x289   :  { %vm832_vm8 = vcmp.eq.f32.partialorder %v1667_v62, %v806_v43  ;;  %v1744_v44 = vcvt.s32.f32 %v958_v41  ;;  %v1746_v45 = vcvt.s32.f32 %v916_v42  ;;  %v875_v41 = vcvt.s32.f32 %v873_v33 }
 0x28a   :  { %v1749_v46 = vsel %vm832_vm8, %v1695_v16, 128  ;;  %v943_v42 = vand.u32 65535, %v1727_v34  ;;  %v957_v43 = vand.u32 65535, %v1735_v39 }
 0x28b   :  { %961 = vmin.xlane.f32.xlu1 %v1744_v44  ;;  %919 = vmin.xlane.f32.xlu0 %v1746_v45  ;;  %v930_v47 = vshra.s32 %v1749_v46, 16 }
 0x28d   :  { %v1754_v48 = vcvt.s32.f32 %v930_v47 }
 0x28f   :  { %933 = vmin.xlane.f32.xlu1 %v1754_v48 }
 0x290   :  { %v816_v49 = vpop.xlane.xlu0 %815 }
 0x291   :  { %vm837_vm9 = vcmp.eq.f32.partialorder %v1670_v0, %v816_v49 }
 0x292   :  { %v1759_v50 = vsel %vm837_vm9, %v1695_v16, 128 }
 0x293   :  { %v1000_v51 = vshra.s32 %v1759_v50, 16 }
 0x294   :  { %v818_v52 = vpop.xlane.xlu1 %817  ;;  %v812_v53 = vpop.xlane.xlu0 %811 }
 0x295   :  { %vm838_vm10 = vcmp.eq.f32.partialorder %v1675_v4, %v818_v52  ;;  %vm835_vm11 = vcmp.eq.f32.partialorder %v1673_v3, %v812_v53  ;;  %v1764_v56 = vcvt.s32.f32 %v1000_v51  ;;  %v929_v51 = vand.u32 65535, %v1749_v46 }
 0x296   :  { %v1767_v54 = vsel %vm838_vm10, %v1695_v16, 128  ;;  %v1770_v55 = vsel %vm835_vm11, %v1695_v16, 128  ;;  %v959_v53 = vcvt.s32.f32 %v957_v43 }
 0x297   :  { %1003 = vmin.xlane.f32.xlu0 %v1764_v56  ;;  %v1014_v57 = vshra.s32 %v1767_v54, 16  ;;  %v972_v58 = vshra.s32 %v1770_v55, 16 }
 0x298   :  { %v814_v59 = vpop.xlane.xlu1 %813 }
 0x299   :  { %vm836_vm12 = vcmp.eq.f32.partialorder %v1679_v6, %v814_v59  ;;  %v1776_v60 = vcvt.s32.f32 %v1014_v57  ;;  %v1778_v61 = vcvt.s32.f32 %v972_v58  ;;  %v931_v57 = vcvt.s32.f32 %v929_v51 }
 0x29a   :  { %v1781_v62 = vsel %vm836_vm12, %v1695_v16, 128  ;;  %v999_v58 = vand.u32 65535, %v1759_v50  ;;  %v1013_v59 = vand.u32 65535, %v1767_v54 }
 0x29b   :  { %1017 = vmin.xlane.f32.xlu1 %v1776_v60  ;;  %975 = vmin.xlane.f32.xlu0 %v1778_v61  ;;  %v986_v63 = vshra.s32 %v1781_v62, 16 }
 0x29d   :  { %v1786_v0 = vcvt.s32.f32 %v986_v63 }
 0x29f   :  { %989 = vmin.xlane.f32.xlu1 %v1786_v0 }
 0x2a2   :  { %v820_v1 = vpop.xlane.xlu0 %819 }
 0x2a3   :  { %vm839_vm13 = vcmp.eq.f32.partialorder %v1682_v9, %v820_v1 }
 0x2a4   :  { %v1791_v2 = vsel %vm839_vm13, %v1695_v16, 128 }
 0x2a5   :  { %v1028_v3 = vshra.s32 %v1791_v2, 16 }
 0x2a6   :  { %v822_v4 = vpop.xlane.xlu1 %821  ;;  %v824_v5 = vpop.xlane.xlu0 %823 }
 0x2a7   :  { %vm840_vm14 = vcmp.eq.f32.partialorder %v1687_v13, %v822_v4  ;;  %vm841_vm15 = vcmp.eq.f32.partialorder %v1685_v12, %v824_v5  ;;  %v1796_v6 = vcvt.s32.f32 %v1028_v3  ;;  %v985_v3 = vand.u32 65535, %v1781_v62 }
 0x2a8   :  { %v1799_v7 = vsel %vm840_vm14, %v1695_v16, 128  ;;  %v1802_v8 = vsel %vm841_vm15, %v1695_v16, 128  ;;  %v1015_v5 = vcvt.s32.f32 %v1013_v59 }
 0x2a9   :  { %1031 = vmin.xlane.f32.xlu0 %v1796_v6  ;;  %v1042_v9 = vshra.s32 %v1799_v7, 16  ;;  %v1056_v10 = vshra.s32 %v1802_v8, 16 }
 0x2aa   :  { %v826_v11 = vpop.xlane.xlu1 %825 }
 0x2ab   :  { %vm842_vm0 = vcmp.eq.f32.partialorder %v1691_v14, %v826_v11  ;;  %v1808_v13 = vcvt.s32.f32 %v1042_v9  ;;  %v1810_v12 = vcvt.s32.f32 %v1056_v10  ;;  %v859_v14 = vand.u32 65535, %v1702_v21 }
 0x2ac   :  { %v1813_v17 = vsel %vm842_vm0, %v1695_v16, 128  ;;  %v987_v9 = vcvt.s32.f32 %v985_v3  ;;  %v1027_v10 = vand.u32 65535, %v1791_v2  ;;  %v1041_v11 = vand.u32 65535, %v1799_v7 }
 0x2ad   :  { %1045 = vmin.xlane.f32.xlu1 %v1808_v13  ;;  %1059 = vmin.xlane.f32.xlu0 %v1810_v12  ;;  %v1070_v19 = vshra.s32 %v1813_v17, 16  ;;  %v861_v18 = vcvt.s32.f32 %v859_v14  ;;  %v1069_v14 = vand.u32 65535, %v1813_v17 }
 0x2af   :  { %v1818_v20 = vcvt.s32.f32 %v1070_v19 }
 0x2b1   :  { %1073 = vmin.xlane.f32.xlu1 %v1818_v20 }
 0x300   :  { %v1824_v26 = vpop.xlane.xlu0 %891 }
 0x301   :  { %vm893_vm1 = vcmp.eq.f32.partialorder %v1704_v23, %v1824_v26 }
 0x302   :  { %v894_v31 = vsel %vm893_vm1, %v889_v27, inf  ;;  %v1043_v27 = vcvt.s32.f32 %v1041_v11  ;;  %vm1092_vm1 = vcmask 130112  }
 0x303   :  { %895 = vmin.xlane.f32.xlu0 %v894_v31  ;;  %v1071_v31 = vcvt.s32.f32 %v1069_v14 }
 0x304   :  { %v1829_v35 = vpop.xlane.xlu1 %905  ;;  %v1831_v36 = vpop.xlane.xlu0 %863 }
 0x305   :  { %vm907_vm2 = vcmp.eq.f32.partialorder %v1715_v29, %v1829_v35  ;;  %vm865_vm3 = vcmp.eq.f32.partialorder %v1717_v30, %v1831_v36  ;;  %v915_v29 = vand.u32 65535, %v1738_v40  ;;  %v945_v30 = vcvt.s32.f32 %v943_v42 }
 0x306   :  { %v908_v21 = vsel %vm907_vm2, %v903_v37, inf  ;;  %v866_v25 = vsel %vm865_vm3, %v861_v18, inf  ;;  %v870_v37 = vcvt.f32.s32 %v1831_v36  ;;  %v912_v18 = vcvt.f32.s32 %v1829_v35 }
 0x307   :  { %909 = vmin.xlane.f32.xlu1 %v908_v21  ;;  %867 = vmin.xlane.f32.xlu0 %v866_v25  ;;  %v917_v34 = vcvt.s32.f32 %v915_v29  ;;  %v1907_v42 = vshrl.u32 %v793_v15, 7  ;;  %v1101_v36 = vadd.s32 4294967272, %v1695_v16  ;;  %vm1099_vm2 = vcmask 195712  }
 0x308   :  { %v1837_v23 = vpop.xlane.xlu1 %877  ;;  %v871_v29 = vshll.u32 %v870_v37, 16  ;;  %vm1106_vm3 = vcmask 261312  }
 0x309   :  { %vm879_vm4 = vcmp.eq.f32.partialorder %v1722_v32, %v1837_v23 }
 0x30a   :  { %v880_v28 = vsel %vm879_vm4, %v875_v41, inf  ;;  %vm1113_vm4 = vcmask 326912  }
 0x30b   :  { %881 = vmin.xlane.f32.xlu1 %v880_v28  ;;  %v1087_v28 = vadd.s32 4294967288, %v1695_v16 }
 0x310   :  { %v1844_v47 = vpop.xlane.xlu0 %947 }
 0x311   :  { %vm949_vm5 = vcmp.eq.f32.partialorder %v1732_v38, %v1844_v47 }
 0x312   :  { %v950_v49 = vsel %vm949_vm5, %v945_v30, inf  ;;  %vm1120_vm5 = vcmask 392512  }
 0x313   :  { %951 = vmin.xlane.f32.xlu0 %v950_v49  ;;  %v913_v49 = vshll.u32 %v912_v18, 16 }
 0x314   :  { %v1849_v52 = vpop.xlane.xlu1 %961  ;;  %v1851_v32 = vpop.xlane.xlu0 %919 }
 0x315   :  { %vm963_vm6 = vcmp.eq.f32.partialorder %v1744_v44, %v1849_v52  ;;  %vm921_vm7 = vcmp.eq.f32.partialorder %v1746_v45, %v1851_v32  ;;  %v971_v44 = vand.u32 65535, %v1770_v55  ;;  %v1001_v45 = vcvt.s32.f32 %v999_v58 }
 0x316   :  { %v964_v39 = vsel %vm963_vm6, %v959_v53, inf  ;;  %v922_v40 = vsel %vm921_vm7, %v917_v34, inf  ;;  %v1090_v34 = vsub.s32 %v1087_v28, %v1907_v42  ;;  %vm1127_vm6 = vcmask 458112  }
 0x317   :  { %965 = vmin.xlane.f32.xlu1 %v964_v39  ;;  %923 = vmin.xlane.f32.xlu0 %v922_v40  ;;  %v973_v50 = vcvt.s32.f32 %v971_v44  ;;  %vm1134_vm7 = vcmask 523712  }
 0x318   :  { %v1857_v38 = vpop.xlane.xlu1 %933 }
 0x319   :  { %vm935_vm8 = vcmp.eq.f32.partialorder %v1754_v48, %v1857_v38 }
 0x31a   :  { %v936_v46 = vsel %vm935_vm8, %v931_v57, inf  ;;  %v1104_v57 = vsub.s32 %v1101_v36, %v1907_v42  ;;  %vm1141_vm8 = vcmask 589312  }
 0x31b   :  { %937 = vmin.xlane.f32.xlu1 %v936_v46 }
 0x320   :  { %v1864_v63 = vpop.xlane.xlu0 %1003 }
 0x321   :  { %vm1005_vm9 = vcmp.eq.f32.partialorder %v1764_v56, %v1864_v63 }
 0x322   :  { %v1006_v1 = vsel %vm1005_vm9, %v1001_v45, inf  ;;  %vm1148_vm9 = vcmask 654912  }
 0x323   :  { %1007 = vmin.xlane.f32.xlu0 %v1006_v1 }
 0x324   :  { %v1869_v4 = vpop.xlane.xlu1 %1017  ;;  %v1871_v48 = vpop.xlane.xlu0 %975 }
 0x325   :  { %vm1019_vm10 = vcmp.eq.f32.partialorder %v1776_v60, %v1869_v4  ;;  %vm977_vm11 = vcmp.eq.f32.partialorder %v1778_v61, %v1871_v48  ;;  %v1055_v60 = vand.u32 65535, %v1802_v8  ;;  %v1029_v61 = vcvt.s32.f32 %v1027_v10 }
 0x326   :  { %v1020_v54 = vsel %vm1019_vm10, %v1015_v5, inf  ;;  %v978_v55 = vsel %vm977_vm11, %v973_v50, inf  ;;  %v926_v5 = vcvt.f32.s32 %v1851_v32  ;;  %v968_v10 = vcvt.f32.s32 %v1849_v52 }
 0x327   :  { %1021 = vmin.xlane.f32.xlu1 %v1020_v54  ;;  %979 = vmin.xlane.f32.xlu0 %v978_v55  ;;  %v1057_v2 = vcvt.s32.f32 %v1055_v60  ;;  %v1122_v32 = vadd.s32 4294967248, %v1695_v16  ;;  %vm1155_vm10 = vcmask 720512   ;;  %vm1162_vm11 = vcmask 786112  }
 0x328   :  { %v1877_v56 = vpop.xlane.xlu1 %989  ;;  %v927_v11 = vshll.u32 %v926_v5, 16 }
 0x329   :  { %vm991_vm12 = vcmp.eq.f32.partialorder %v1786_v0, %v1877_v56 }
 0x32a   :  { %v992_v62 = vsel %vm991_vm12, %v987_v9, inf  ;;  %v1108_v9 = vadd.s32 4294967264, %v1695_v16  ;;  %vm1169_vm12 = vcmask 851712  }
 0x32b   :  { %993 = vmin.xlane.f32.xlu1 %v992_v62  ;;  %v954_v62 = vcvt.f32.s32 %v1844_v47 }
 0x32c   :  { %v1111_v14 = vsub.s32 %v1108_v9, %v1907_v42 }
 0x32d   :  { %v955_v47 = vshll.u32 %v954_v62, 16 }
 0x332   :  { %v1884_v19 = vpop.xlane.xlu0 %1031 }
 0x333   :  { %vm1033_vm13 = vcmp.eq.f32.partialorder %v1796_v6, %v1884_v19 }
 0x334   :  { %v1034_v22 = vsel %vm1033_vm13, %v1029_v61, inf  ;;  %vm1176_vm13 = vcmask 917312  }
 0x335   :  { %1035 = vmin.xlane.f32.xlu0 %v1034_v22  ;;  %v940_v22 = vcvt.f32.s32 %v1857_v38 }
 0x336   :  { %v1889_v24 = vpop.xlane.xlu1 %1045  ;;  %v1891_v0 = vpop.xlane.xlu0 %1059 }
 0x337   :  { %vm1047_vm14 = vcmp.eq.f32.partialorder %v1808_v13, %v1889_v24  ;;  %vm1061_vm15 = vcmp.eq.f32.partialorder %v1810_v12, %v1891_v0  ;;  %v898_v13 = vcvt.f32.s32 %v1824_v26  ;;  %v884_v12 = vcvt.f32.s32 %v1837_v23 }
 0x338   :  { %v1048_v7 = vsel %vm1047_vm14, %v1043_v27, inf  ;;  %v1062_v8 = vsel %vm1061_vm15, %v1057_v2, inf  ;;  %v1085_v23 = vsub.s32 %v1695_v16, %v1907_v42  ;;  %v1115_v2 = vadd.s32 4294967256, %v1695_v16 }
 0x339   :  { %1049 = vmin.xlane.f32.xlu1 %v1048_v7  ;;  %1063 = vmin.xlane.f32.xlu0 %v1062_v8  ;;  %v899_v26 = vshll.u32 %v898_v13, 16  ;;  %v885_v35 = vshll.u32 %v884_v12, 16  ;;  %v1129_v8 = vadd.s32 4294967240, %v1695_v16  ;;  %v941_v37 = vshll.u32 %v940_v22, 16 }
 0x33a   :  { %v1897_v6 = vpop.xlane.xlu1 %1073  ;;  %v1118_v38 = vsub.s32 %v1115_v2, %v1907_v42  ;;  %v1125_v12 = vsub.s32 %v1122_v32, %v1907_v42  ;;  %vm1183_vm14 = vcmask 982912   ;;  %vm1190_vm15 = vcmask 1048512  }
 0x33b   :  { %vm1075_vm0 = vcmp.eq.f32.partialorder %v1818_v20, %v1897_v6  ;;  %v1094_v20 = vadd.s32 4294967280, %v1695_v16 }
 0x33c   :  { %v1076_v17 = vsel %vm1075_vm0, %v1071_v31, inf }
 0x33d   :  { %1077 = vmin.xlane.f32.xlu1 %v1076_v17  ;;  %v1097_v15 = vsub.s32 %v1094_v20, %v1907_v42 }
 0x38c   :  { %v896_v33 = vpop.xlane.xlu0 %895 }
 0x38d   :  { %v897_v43 = vcvt.f32.s32 %v896_v33  ;;  %v969_v33 = vshll.u32 %v968_v10, 16 }
 0x38f   :  { %v900_v40 = vadd.s32 %v899_v26, %v897_v43  ;;  %v982_v26 = vcvt.f32.s32 %v1871_v48  ;;  %v1150_v48 = vadd.s32 4294967216, %v1695_v16 }
 0x390   :  { %v910_v21 = vpop.xlane.xlu1 %909  ;;  %v868_v25 = vpop.xlane.xlu0 %867 }
 0x391   :  { %v869_v41 = vcvt.f32.s32 %v868_v25  ;;  %v911_v30 = vcvt.f32.s32 %v910_v21  ;;  %v1098_v45 = vrot.slane %v900_v40, %v1097_v15  ;;  %v1132_v25 = vsub.s32 %v1129_v8, %v1907_v42 }
 0x392   :  { %v1153_v9 = vsub.s32 %v1150_v48, %v1907_v42 }
 0x393   :  { %v872_v53 = vadd.s32 %v871_v29, %v869_v41  ;;  %v914_v46 = vadd.s32 %v913_v49, %v911_v30 }
 0x394   :  { %v882_v51 = vpop.xlane.xlu1 %881 }
 0x395   :  { %v883_v39 = vcvt.f32.s32 %v882_v51  ;;  %v1086_v59 = vrot.slane %v872_v53, %v1085_v23  ;;  %v1105_v1 = vrot.slane %v914_v46, %v1104_v57  ;;  %v1136_v23 = vadd.s32 4294967232, %v1695_v16 }
 0x396   :  { %v1010_v53 = vcvt.f32.s32 %v1864_v63  ;;  %v996_v57 = vcvt.f32.s32 %v1877_v56 }
 0x397   :  { %v886_v58 = vadd.s32 %v885_v35, %v883_v39  ;;  %v983_v39 = vshll.u32 %v982_v26, 16  ;;  %v1139_v46 = vsub.s32 %v1136_v23, %v1907_v42 }
 0x398   :  { %v1011_v63 = vshll.u32 %v1010_v53, 16 }
 0x399   :  { %v1091_v44 = vrot.slane %v886_v58, %v1090_v34  ;;  %v1024_v34 = vcvt.f32.s32 %v1869_v4 }
 0x39b   :  { %v1093_v3 = vsel %vm1092_vm1, %v1091_v44, %v1086_v59  ;;  %v1143_v59 = vadd.s32 4294967224, %v1695_v16  ;;  %v1025_v5 = vshll.u32 %v1024_v34, 16 }
 0x39c   :  { %v1100_v50 = vsel %vm1099_vm2, %v1098_v45, %v1093_v3  ;;  %v952_v54 = vpop.xlane.xlu0 %951  ;;  %v1157_v45 = vadd.s32 4294967208, %v1695_v16 }
 0x39d   :  { %v1107_v55 = vsel %vm1106_vm3, %v1105_v1, %v1100_v50  ;;  %v953_v7 = vcvt.f32.s32 %v952_v54  ;;  %v997_v50 = vshll.u32 %v996_v57, 16  ;;  %v1146_v56 = vsub.s32 %v1143_v59, %v1907_v42 }
 0x39e   :  { %v1160_v10 = vsub.s32 %v1157_v45, %v1907_v42 }
 0x39f   :  { %v956_v21 = vadd.s32 %v955_v47, %v953_v7  ;;  %v1164_v7 = vadd.s32 4294967200, %v1695_v16  ;;  %v1066_v47 = vcvt.f32.s32 %v1891_v0 }
 0x3a0   :  { %v966_v60 = vpop.xlane.xlu1 %965  ;;  %v924_v61 = vpop.xlane.xlu0 %923 }
 0x3a1   :  { %v925_v27 = vcvt.f32.s32 %v924_v61  ;;  %v967_v31 = vcvt.f32.s32 %v966_v60  ;;  %v1126_v29 = vrot.slane %v956_v21, %v1125_v12  ;;  %v1067_v21 = vshll.u32 %v1066_v47, 16 }
 0x3a3   :  { %v928_v17 = vadd.s32 %v927_v11, %v925_v27  ;;  %v970_v41 = vadd.s32 %v969_v33, %v967_v31  ;;  %v1038_v27 = vcvt.f32.s32 %v1884_v19  ;;  %v1052_v31 = vcvt.f32.s32 %v1889_v24 }
 0x3a4   :  { %v938_v52 = vpop.xlane.xlu1 %937 }
 0x3a5   :  { %v1112_v13 = vrot.slane %v928_v17, %v1111_v14  ;;  %v939_v18 = vcvt.f32.s32 %v938_v52  ;;  %v1133_v36 = vrot.slane %v970_v41, %v1132_v25  ;;  %v1171_v52 = vadd.s32 4294967192, %v1695_v16 }
 0x3a6   :  { %v1053_v19 = vshll.u32 %v1052_v31, 16  ;;  %v1080_v25 = vcvt.f32.s32 %v1897_v6 }
 0x3a7   :  { %v1114_v28 = vsel %vm1113_vm4, %v1112_v13, %v1107_v55  ;;  %v942_v20 = vadd.s32 %v941_v37, %v939_v18  ;;  %v1039_v37 = vshll.u32 %v1038_v27, 16  ;;  %v1167_v13 = vsub.s32 %v1164_v7, %v1907_v42 }
 0x3a8   :  { %v1178_v18 = vadd.s32 4294967184, %v1695_v16  ;;  %v1174_v24 = vsub.s32 %v1171_v52, %v1907_v42 }
 0x3a9   :  { %v1119_v43 = vrot.slane %v942_v20, %v1118_v38 }
 0x3ab   :  { %v1121_v30 = vsel %vm1120_vm5, %v1119_v43, %v1114_v28 }
 0x3ac   :  { %v1128_v49 = vsel %vm1127_vm6, %v1126_v29, %v1121_v30  ;;  %v1008_v35 = vpop.xlane.xlu0 %1007  ;;  %v1185_v29 = vadd.s32 4294967176, %v1695_v16 }
 0x3ad   :  { %v1135_v51 = vsel %vm1134_vm7, %v1133_v36, %v1128_v49  ;;  %v1009_v44 = vcvt.f32.s32 %v1008_v35  ;;  %v1181_v36 = vsub.s32 %v1178_v18, %v1907_v42 }
 0x3ae   :  { %v1188_v6 = vsub.s32 %v1185_v29, %v1907_v42 }
 0x3af   :  { %v1012_v62 = vadd.s32 %v1011_v63, %v1009_v44 }
 0x3b0   :  { %v1022_v15 = vpop.xlane.xlu1 %1021  ;;  %v980_v40 = vpop.xlane.xlu0 %979 }
 0x3b1   :  { %v981_v58 = vcvt.f32.s32 %v980_v40  ;;  %v1023_v1 = vcvt.f32.s32 %v1022_v15  ;;  %v1154_v14 = vrot.slane %v1012_v62, %v1153_v9 }
 0x3b3   :  { %v984_v3 = vadd.s32 %v983_v39, %v981_v58  ;;  %v1026_v11 = vadd.s32 %v1025_v5, %v1023_v1 }
 0x3b4   :  { %v994_v4 = vpop.xlane.xlu1 %993 }
 0x3b5   :  { %v1140_v54 = vrot.slane %v984_v3, %v1139_v46  ;;  %v995_v55 = vcvt.f32.s32 %v994_v4  ;;  %v1161_v2 = vrot.slane %v1026_v11, %v1160_v10 }
 0x3b7   :  { %v1142_v60 = vsel %vm1141_vm8, %v1140_v54, %v1135_v51  ;;  %v998_v61 = vadd.s32 %v997_v50, %v995_v55  ;;  %v1081_v51 = vshll.u32 %v1080_v25, 16 }
 0x3b9   :  { %v1147_v22 = vrot.slane %v998_v61, %v1146_v56 }
 0x3bb   :  { %v1149_v32 = vsel %vm1148_vm9, %v1147_v22, %v1142_v60 }
 0x3bc   :  { %v1156_v8 = vsel %vm1155_vm10, %v1154_v14, %v1149_v32 }
 0x3bd   :  { %v1163_v17 = vsel %vm1162_vm11, %v1161_v2, %v1156_v8 }
 0x3be   :  { %v1036_v33 = vpop.xlane.xlu0 %1035 }
 0x3bf   :  { %v1037_v38 = vcvt.f32.s32 %v1036_v33 }
 0x3c1   :  { %v1040_v12 = vadd.s32 %v1039_v37, %v1037_v38 }
 0x3c2   :  { %v1050_v41 = vpop.xlane.xlu1 %1049  ;;  %v1064_v28 = vpop.xlane.xlu0 %1063 }
 0x3c3   :  { %v1168_v0 = vrot.slane %v1040_v12, %v1167_v13  ;;  %v1051_v20 = vcvt.f32.s32 %v1050_v41  ;;  %v1065_v43 = vcvt.f32.s32 %v1064_v28 }
 0x3c5   :  { %v1170_v30 = vsel %vm1169_vm12, %v1168_v0, %v1163_v17  ;;  %v1054_v26 = vadd.s32 %v1053_v19, %v1051_v20  ;;  %v1068_v49 = vadd.s32 %v1067_v21, %v1065_v43 }
 0x3c6   :  { %v1078_v35 = vpop.xlane.xlu1 %1077 }
 0x3c7   :  { %v1175_v23 = vrot.slane %v1054_v26, %v1174_v24  ;;  %v1079_v53 = vcvt.f32.s32 %v1078_v35  ;;  %v1182_v34 = vrot.slane %v1068_v49, %v1181_v36 }
 0x3c9   :  { %v1082_v39 = vadd.s32 %v1081_v51, %v1079_v53  ;;  %v1177_v15 = vsel %vm1176_vm13, %v1175_v23, %v1170_v30 }
 0x3ca   :  { %v1184_v40 = vsel %vm1183_vm14, %v1182_v34, %v1177_v15 }
 0x3cb   :  { %v1189_v16 = vrot.slane %v1082_v39, %v1188_v6 }
 0x3cd   :  { %v1191_v57 = vsel %vm1190_vm15, %v1189_v16, %v1184_v40 }
 0x3ce   :  { %1192 = vst [vmem:[#allocation8] sm:$0x1] %v1191_v57 }
 0x3cf   :  { %1558 = shalt.err (!%p1555_p5)
}
 0x3d0   :  { %1202 = dma.vmem_to_hbm [thread:$0]  %s1200_s13, 16, %s1960_s5, [#allocation4]  }
 0x3d1   :  { %1571 = dma.done.wait [#allocation4], 16  }
 0x3d2   :  { %1572 = vsyncadd [#allocation4], 4294967280 }
 0x3d3   :  { %1206 = vsyncpa [#allocation3], 1 }
 0x3d4   :  { %1207 = vsyncpa [#allocation6], 1 }
 0x3d5   :  { %1208 = vsyncpa [#allocation4], 1 }

</bundles_post_ra>
